<compile_context>
chip_gen: v6e
topology: v6e:2x2x1
jax: 0.10.0
libtpu: 0.0.40
codegen_flags: <defaults>
</compile_context>

<pallas_src>
import math

import jax
import jax.numpy as jnp
from jax.experimental import pallas as pl
from jax.experimental.pallas import tpu as pltpu

FEAT_DIM = 32 * 10             # c4 * 10 = 320
NUM_CLASSES = 4
TB_MAX = 8192                  # batch-tile cap: f32 tile 10 MiB, 20 MiB double-buffered
MEGACORE_SPLIT_THRESHOLD = 4096  # above this, force >=2 grid steps (v7x dual-TC)


def _round_up(n, m):
    return ((n + m - 1) // m) * m


def _cdiv(a, b):
    return -(-a // b)


def _choose_batch_tile(B):
    """Pick (TB, n_tiles): TB multiple of 8 (or == B), ragged tail < 8 rows/tile,
    and >=2 tiles for large batches so v7x can shard the parallel axis."""
    n_tiles = _cdiv(B, TB_MAX)
    if B >= MEGACORE_SPLIT_THRESHOLD:
        n_tiles = max(n_tiles, 2)
    tb = min(B, _round_up(_cdiv(B, n_tiles), 8))
    return tb, _cdiv(B, tb)


def _linear_softmax_kernel(x_ref, w_ref, b_ref, o_ref):
    # x arrives straight from HBM in its native dtype (no wrapper cast = no
    # extra HBM pass); the bf16 cast for the MXU happens on-chip (free, VPU).
    x = x_ref[...].astype(jnp.bfloat16)                       # (TB, F)
    logits = jnp.dot(x, w_ref[...],
                     preferred_element_type=jnp.float32) + b_ref[...]  # (TB, C) f32
    # Numerically stable softmax over the class axis; EXACT division so each
    # row sums to 1 (approx reciprocal broke the row-sum check).
    m = jnp.max(logits, axis=-1, keepdims=True)
    e = jnp.exp(logits - m)
    denom = jnp.sum(e, axis=-1, keepdims=True)
    o_ref[...] = (e / denom).astype(o_ref.dtype)


def linear_classifier_forward(features, weight, bias):
    """features: squeezable to (B, FEAT_DIM); weight: (C, F); bias: (C,)."""
    x = jnp.squeeze(features)                  # mimics torch .squeeze()
    if x.ndim == 1:                            # single-sample edge case
        x = x[None, :]
    B, F = x.shape
    assert F == FEAT_DIM

    TB, n_tiles = _choose_batch_tile(B)

    w_t = weight.T.astype(jnp.bfloat16)        # (F, C): ~2.5 KB, resident across grid
    b2 = bias.reshape(1, NUM_CLASSES).astype(jnp.float32)

    cost = pl.CostEstimate(
        flops=2 * B * FEAT_DIM * NUM_CLASSES,
        transcendentals=B * NUM_CLASSES,
        bytes_accessed=(B * FEAT_DIM * x.dtype.itemsize      # x (streamed)
                        + FEAT_DIM * NUM_CLASSES * 2          # w (bf16, resident)
                        + NUM_CLASSES * 4                     # bias
                        + B * NUM_CLASSES * 4),               # out (f32)
    )

    out = pl.pallas_call(
        _linear_softmax_kernel,
        out_shape=jax.ShapeDtypeStruct((B, NUM_CLASSES), jnp.float32),
        grid_spec=pltpu.PrefetchScalarGridSpec(
            num_scalar_prefetch=0,
            grid=(n_tiles,),                   # ragged last block, no jnp.pad
            in_specs=[
                pl.BlockSpec((TB, FEAT_DIM), lambda i: (i, 0)),
                pl.BlockSpec((FEAT_DIM, NUM_CLASSES), lambda i: (0, 0)),
                pl.BlockSpec((1, NUM_CLASSES), lambda i: (0, 0)),
            ],
            out_specs=pl.BlockSpec((TB, NUM_CLASSES), lambda i: (i, 0)),
        ),
        compiler_params=pltpu.CompilerParams(
            dimension_semantics=("parallel",),            # megacore-shardable on v7x
            vmem_limit_bytes=32 * 1024 * 1024),           # > v5e's 16 MiB default
        cost_estimate=cost,
    )(x, w_t, b2)

    return out


if __name__ == "__main__":
    key = jax.random.PRNGKey(0)
    k_x, k_w, k_b = jax.random.split(key, 3)

    B = 8
    # Pooled conv feature map, NCHW-style: (B, feat_dim, 1, 1).
    features = jax.random.normal(k_x, (B, FEAT_DIM, 1, 1), dtype=jnp.float32)

    # Deterministic nn.Linear-style init: U(-1/sqrt(fan_in), 1/sqrt(fan_in)).
    bound = 1.0 / math.sqrt(FEAT_DIM)
    weight = jax.random.uniform(k_w, (NUM_CLASSES, FEAT_DIM),
                                minval=-bound, maxval=bound, dtype=jnp.float32)
    bias = jax.random.uniform(k_b, (NUM_CLASSES,),
                              minval=-bound, maxval=bound, dtype=jnp.float32)

    out = linear_classifier_forward(features, weight, bias)
    out = jax.block_until_ready(out)

    x2 = jnp.squeeze(features)
    # Reference with the same bf16 operand quantization (f32 accumulation).
    x_bf = x2.astype(jnp.bfloat16).astype(jnp.float32)
    w_bf = weight.astype(jnp.bfloat16).astype(jnp.float32)
    ref_bf = jax.nn.softmax(x_bf @ w_bf.T + bias, axis=1)
    # Full-f32 PyTorch-equivalent reference (looser tolerance: bf16 MXU inputs).
    ref_f32 = jax.nn.softmax(x2 @ weight.T + bias, axis=1)

    assert out.shape == (B, NUM_CLASSES)
    assert jnp.allclose(jnp.sum(out, axis=1), 1.0, atol=1e-4)     # exact division
    assert jnp.allclose(out, ref_bf, atol=2e-3, rtol=2e-3)
    assert jnp.allclose(out, ref_f32, atol=2e-2, rtol=2e-2)

    print("KERNEL_OK")
</pallas_src>

<mosaic_0001>
module attributes {stable_mosaic.version = 11 : i64} {
  func.func @_linear_softmax_kernel(%arg0: i32, %arg1: memref<8x320xf32, #tpu.memory_space<vmem>>, %arg2: memref<320x4xbf16, #tpu.memory_space<vmem>>, %arg3: memref<1x4xf32, #tpu.memory_space<vmem>>, %arg4: memref<8x4xf32, #tpu.memory_space<vmem>>) attributes {dimension_semantics = [#tpu.dimension_semantics<parallel>], iteration_bounds = array<i64: 1>, scalar_prefetch = 0 : i64, scratch_operands = 0 : i64, tpu.core_type = #tpu.core_type<tc>, window_params = [{transform_indices = @transform_0, window_bounds = array<i64: 8, 320>}, {pipeline_mode = #tpu.pipeline_mode<synchronous>, transform_indices = @transform_1, window_bounds = array<i64: 320, 4>}, {pipeline_mode = #tpu.pipeline_mode<synchronous>, transform_indices = @transform_2, window_bounds = array<i64: 1, 4>}, {transform_indices = @transform_3, window_bounds = array<i64: 8, 4>}]} {
    %c0 = arith.constant 0 : index
    %c0_0 = arith.constant 0 : index
    %0 = vector.load %arg1[%c0, %c0_0] : memref<8x320xf32, #tpu.memory_space<vmem>>, vector<8x320xf32>
    %1 = arith.truncf %0 : vector<8x320xf32> to vector<8x320xbf16>
    %c0_1 = arith.constant 0 : index
    %c0_2 = arith.constant 0 : index
    %2 = vector.load %arg2[%c0_1, %c0_2] : memref<320x4xbf16, #tpu.memory_space<vmem>>, vector<320x4xbf16>
    %cst = arith.constant dense<0.000000e+00> : vector<8x4xf32>
    %3 = tpu.matmul %1, %2, %cst {dimension_numbers = #tpu.dot_dimension_numbers<[1], [0], [0], [1], [0, 0, 1, 1], [], []>} : vector<8x320xbf16>, vector<320x4xbf16>, vector<8x4xf32> -> vector<8x4xf32>
    %c0_3 = arith.constant 0 : index
    %c0_4 = arith.constant 0 : index
    %4 = vector.load %arg3[%c0_3, %c0_4] : memref<1x4xf32, #tpu.memory_space<vmem>>, vector<1x4xf32>
    %5 = vector.broadcast %4 : vector<1x4xf32> to vector<8x4xf32>
    %6 = arith.addf %3, %5 : vector<8x4xf32>
    %cst_5 = arith.constant dense<0xFF800000> : vector<8xf32>
    %7 = vector.multi_reduction <maximumf>, %6, %cst_5 [1] : vector<8x4xf32> to vector<8xf32>
    %8 = vector.shape_cast %7 : vector<8xf32> to vector<8x1xf32>
    %9 = vector.broadcast %8 : vector<8x1xf32> to vector<8x4xf32>
    %10 = arith.subf %6, %9 : vector<8x4xf32>
    %11 = math.exp %10 : vector<8x4xf32>
    %cst_6 = arith.constant dense<0.000000e+00> : vector<8xf32>
    %12 = vector.multi_reduction <add>, %11, %cst_6 [1] : vector<8x4xf32> to vector<8xf32>
    %13 = vector.shape_cast %12 : vector<8xf32> to vector<8x1xf32>
    %14 = vector.broadcast %13 : vector<8x1xf32> to vector<8x4xf32>
    %15 = arith.divf %11, %14 : vector<8x4xf32>
    %c0_7 = arith.constant 0 : index
    %c0_8 = arith.constant 0 : index
    %16 = vector.load %arg4[%c0_7, %c0_8] : memref<8x4xf32, #tpu.memory_space<vmem>>, vector<8x4xf32>
    tpu.vector_store %arg4[%c0_7, %c0_8], %15 {strides = array<i32>} : memref<8x4xf32, #tpu.memory_space<vmem>>, vector<8x4xf32>,
    return
  }
  func.func @transform_0(%arg0: i32) -> (i32, i32) {
    %c0_i32 = arith.constant 0 : i32
    %c0_i32_0 = arith.constant 0 : i32
    return %arg0, %c0_i32 : i32, i32
  }
  func.func @transform_1(%arg0: i32) -> (i32, i32) {
    %c0_i32 = arith.constant 0 : i32
    %c0_i32_0 = arith.constant 0 : i32
    %c0_i32_1 = arith.constant 0 : i32
    return %c0_i32, %c0_i32_0 : i32, i32
  }
  func.func @transform_2(%arg0: i32) -> (i32, i32) {
    %c0_i32 = arith.constant 0 : i32
    %c0_i32_0 = arith.constant 0 : i32
    %c0_i32_1 = arith.constant 0 : i32
    return %c0_i32, %c0_i32_0 : i32, i32
  }
  func.func @transform_3(%arg0: i32) -> (i32, i32) {
    %c0_i32 = arith.constant 0 : i32
    %c0_i32_0 = arith.constant 0 : i32
    return %arg0, %c0_i32 : i32, i32
  }
}

</mosaic_0001>

<bundles_post_ra>
// kernel: tpu_custom_call.1
= control target key start
LH: loop header
LB: loop body
LE: loop exit
PB: predicated region body
PF: predicated region fallthrough
CT: control target
= control target key end

     0   :  { %v376_v1 = vmov 0.0   ;;  %vm377_vm0 = vmmov 0   ;;  %vm188_vm1 = vcmask 523264   ;;  %vm272_vm2 = vcmask 31744   ;;  %s476_s1 = inlined_call_operand.vmem [shape: bf16[320,4], index: 1, kind: input, shape index: {}]   ;;  %s477_s0 = inlined_call_operand.vmem [shape: f32[8,320], index: 0, kind: input, shape index: {}]   ;;  %s478_s2 = inlined_call_operand.vmem [shape: f32[1,4], index: 2, kind: input, shape index: {}]   ;;  %s479_s3 = inlined_call_operand.vmem [shape: f32[8,4], index: 3, kind: output, shape index: {}]  }
   0x1   :  { %v352_v0 = vld [vmem:[%s476_s1 + $0x78] sm:$0xff]   ;;  %338 = vmatprep.subr.bf16.mxu1 %v376_v1  ;;  %346 = vmatprep.mubr.msk.bf16.mxu1 %vm377_vm0, %v376_v1  ;;  %v354_v3 = vld [vmem:[%s476_s1 + $0x70] sm:$0xff]   ;;  %v356_v5 = vld [vmem:[%s476_s1 + $0x68] sm:$0xff]  }
   0x2   :  { %v353_v2 = vld [vmem:[%s476_s1 + $0x38] sm:$0xff]   ;;  %311 = vmatprep.subr.bf16.mxu0 %v352_v0  ;;  %v355_v4 = vld [vmem:[%s476_s1 + $0x30] sm:$0xff]   ;;  %v357_v6 = vld [vmem:[%s476_s1 + $0x28] sm:$0xff]  }
   0x3   :  { %312 = vmatpush3.bf16.msra.mxu0 %v353_v2  ;;  %v358_v7 = vld [vmem:[%s476_s1 + $0x60] sm:$0xff]   ;;  %v362_v8 = vld [vmem:[%s476_s1 + $0x98] sm:$0xff]   ;;  %v365_v11 = vld [vmem:[%s476_s1 + $0x90] sm:$0xff]  }
   0x4   :  { %313 = vmatprep.subr.bf16.mxu0 %v354_v3  ;;  %v359_v9 = vld [vmem:[%s476_s1 + $0x20] sm:$0xff]   ;;  %v360_v10 = vld [vmem:[%s476_s1 + $0x58] sm:$0xff]   ;;  %339 = vmatpush3.bf16.msra.mxu1 %v362_v8  ;;  %v363_v13 = vld [vmem:[%s476_s1 + $0x50] sm:$0xff]  }
   0x5   :  { %340 = vmatprep.subr.bf16.mxu1 %v376_v1  ;;  %v361_v12 = vld [vmem:[%s476_s1 + $0x18] sm:$0xff]   ;;  %v368_v14 = vld [vmem:[%s476_s1 + $0x88] sm:$0xff]   ;;  %v364_v15 = vld [vmem:[%s476_s1 + $0x10] sm:$0xff]  }
   0x6   :  { %v366_v16 = vld [vmem:[%s476_s1 + $0x48] sm:$0xff]   ;;  %v371_v17 = vld [vmem:[%s476_s1 + $0x80] sm:$0xff]   ;;  %v17_v19 = vld [vmem:[%s477_s0 + $0x10] sm:$0xff] }
   0x7   :  { %314 = vmatpush3.bf16.msra.mxu0 %v355_v4  ;;  %v16_v18 = vld [vmem:[%s477_s0 + $0x8] sm:$0xff]  ;;  %v20_v22 = vpack.c.bf16 %v17_v19, %v17_v19  ;;  %v369_v23 = vld [vmem:[%s476_s1 + $0x40] sm:$0xff]  }
   0x8   :  { %315 = vmatprep.subr.bf16.mxu0 %v356_v5  ;;  %341 = vmatpush3.bf16.msra.mxu1 %v365_v11  ;;  %v19_v20 = vpack.c.bf16 %v16_v18, %v16_v18  ;;  %v367_v21 = vld [vmem:[%s476_s1 + $0x8] sm:$0xff]   ;;  %v370_v24 = vld [vmem:[%s476_s1] sm:$0xff]  }
   0x9   :  { %342 = vmatprep.subr.bf16.mxu1 %v376_v1  ;;  %v15_v25 = vld [vmem:[%s477_s0] sm:$0xff] }
   0xa   :  { %224 = vmatprep.mubr.bf16.mxu0 %v19_v20  ;;  %v18_v26 = vpack.c.bf16 %v15_v25, %v15_v25  ;;  %v289_v32 = vld [vmem:[%s478_s2] ss:$0 sm:$0xff] }
   0xb   :  { %316 = vmatpush3.bf16.msra.mxu0 %v357_v6 }
   0xc   :  { %317 = vmatprep.subr.bf16.mxu0 %v358_v7  ;;  %343 = vmatpush3.bf16.msra.mxu1 %v368_v14 }
   0xd   :  { %344 = vmatprep.subr.bf16.mxu1 %v376_v1 }
   0xf   :  { %318 = vmatpush3.bf16.msra.mxu0 %v359_v9 }
  0x10   :  { %319 = vmatprep.subr.bf16.mxu0 %v360_v10  ;;  %345 = vmatpush3.bf16.msra.mxu1 %v371_v17 }
  0x13   :  { %320 = vmatpush3.bf16.msra.mxu0 %v361_v12  ;;  %347 = vmatmul.mubr.msk.bf16.vlgmr.msra.gmra.mxu1 %vm188_vm1, %v20_v22 }
  0x14   :  { %321 = vmatprep.subr.bf16.mxu0 %v363_v13 }
  0x17   :  { %322 = vmatpush3.bf16.msra.mxu0 %v364_v15 }
  0x18   :  { %323 = vmatprep.subr.bf16.mxu0 %v366_v16 }
  0x1b   :  { %324 = vmatpush3.bf16.msra.mxu0 %v367_v21 }
  0x1c   :  { %325 = vmatprep.subr.bf16.mxu0 %v369_v23 }
  0x1f   :  { %326 = vmatpush3.bf16.msra.mxu0 %v370_v24 }
  0x22   :  { %225 = vmatmul.mubr.bf16.vlgmr.msra.gmra.mxu0 %v18_v26 }
  0xd3   :  { %v266_v27 = vpop.f32.mrf.mxu1 }
  0xd5   :  { %v348_v28 = vpop.f32.mrf.mxu1 }
  0xd7   :  { %v269_v29 = vpop.f32.mrf.mxu1 }
  0xd9   :  { %v349_v30 = vpop.f32.mrf.mxu1 }
  0xe2   :  { %v327_v31 = vpop.f32.mrf.mxu0 }
  0xe4   :  { %v328_v33 = vpop.f32.mrf.mxu0 }
  0xe5   :  { %v329_v34 = vadd.f32 %v328_v33, %v327_v31 }
  0xe6   :  { %v330_v35 = vpop.f32.mrf.mxu0 }
  0xe7   :  { %v227_v36 = vadd.f32 %v329_v34, %v289_v32 }
  0xe8   :  { %v331_v37 = vpop.f32.mrf.mxu0 }
  0xe9   :  { %v267_v38 = vadd.f32 %v266_v27, %v227_v36 }
  0xeb   :  { %v273_v39 = vsel %vm272_vm2, %v267_v38, -inf }
  0xec   :  { %274 = vmax.xlane.f32.xlu0 %v273_v39 }
 0x175   :  { %v275_v40 = vpop.xlane.xlu0 %274 }
 0x176   :  { %v276_v41 = vsub.f32 %v267_v38, %v275_v40 }
 0x178   :  { %v277_v42 = vmul.f32 1.442695, %v276_v41 }
 0x17a   :  { %372 = vpow2.f32 %v277_v42 }
 0x187   :  { %v373_v43 = vpop.eup %372 }
 0x188   :  { %v279_v44 = vsel %vm272_vm2, %v373_v43, 0.0 }
 0x189   :  { %280 = vadd.xlane.f32.xlu0 %v279_v44 }
 0x212   :  { %v281_v45 = vpop.xlane.xlu0 %280 }
 0x213   :  { %374 = vrcp.f32 %v281_v45 }
 0x220   :  { %v375_v46 = vpop.eup %374 }
 0x221   :  { %v283_v47 = vmul.f32 %v375_v46, %v373_v43 }
 0x223   :  { %284 = vst.msk [vmem:[%s479_s3] sm:$0xff] %vm272_vm2, %v283_v47 }

</bundles_post_ra>
